<compile_context>
chip_gen: v6e
topology: v6e:2x2x1
jax: 0.10.0
libtpu: 0.0.40
codegen_flags: <defaults>
</compile_context>

<pallas_src>
import functools

import jax
import jax.numpy as jnp
import numpy as np
from jax import lax
from jax.experimental import pallas as pl
from jax.experimental.pallas import tpu as pltpu


def _round_up(n, m):
    return ((n + m - 1) // m) * m


def _choose_chunk(hw, target=512):
    """Lane-dense inner chunk: multiple of 128 dividing HW (or full HW).

    target=512 keeps the in-kernel (Cf, chunk) f32 conv slab at ~4 MiB even at
    ResNet-like Cf=2048, comfortably inside scoped VMEM on v5e/v6e/v7x; raise
    together with vmem_limit_bytes on v6e (128 MiB physical) if desired.
    """
    if hw % 128 != 0:
        return hw  # full-dim block: no 128-alignment requirement
    t = max(128, min((target // 128) * 128, hw))
    while hw % t != 0:
        t -= 128
    return t


def conv_pool_kernel(x_ref, wc_ref, bc_ref, pooled_ref, acc_ref, *,
                     num_chunks, chunk, inv_hw):
    """Per-image: [trunk stand-in 1x1 conv on MXU] -> ReLU -> global avg pool.

    Grid = (B,); each step consumes one whole image (a single large DMA) and
    chunks the compute internally so the (Cf, chunk) f32 slab stays bounded.

    x_ref      : (1, Cin, HW) f32   pixels of image b (pixels on the lane axis)
    wc_ref     : (Cf, Cin)   bf16   1x1-conv weight (trunk stand-in)
    bc_ref     : (Cf, 1)     f32    1x1-conv bias
    pooled_ref : (1, 1, Cf)  f32    pooled features of image b (lane-dense row)
    acc_ref    : (Cf, 1)     f32    scratch: running spatial sum
    """
    acc_ref[...] = jnp.zeros_like(acc_ref)
    wc = wc_ref[...]            # (Cf, Cin) bf16 — loop-invariant, loaded once
    bc = bc_ref[...]            # (Cf, 1)  f32 — hoisted out of the chunk loop

    def body(i, carry):
        start = pl.multiple_of(i * chunk, chunk)
        # Lane-dense pixel chunk; bf16 cast happens in-kernel (no extra HBM pass).
        x = x_ref[0, :, pl.ds(start, chunk)].astype(jnp.bfloat16)   # (Cin, chunk)
        # MXU matmul (K=Cin is tiny but the MXU is otherwise idle), f32 accumulate.
        f = jnp.dot(wc, x, preferred_element_type=jnp.float32)      # (Cf, chunk)
        f = jnp.maximum(f + bc, 0.0)                                # fused ReLU
        # Fused pooling accumulate: lane-reduce this chunk (XLU) into VMEM scratch.
        acc_ref[...] += jnp.sum(f, axis=1, keepdims=True)
        return carry

    lax.fori_loop(0, num_chunks, body, 0, unroll=num_chunks <= 8)

    # Single (Cf,1)->(1,Cf) relayout per image; the pooled row write is lane-dense.
    pooled_ref[...] = (acc_ref[...] * inv_hw).reshape(1, 1, -1)


def linear_bn_kernel(pooled_ref, wl_ref, bl_ref, g_ref, beta_ref, o_ref, *, eps):
    """Linear head + BatchNorm1d (training-mode batch statistics), one step.

    pooled_ref : (B, 1, Cf)  f32
    wl_ref     : (Cf, E_pad) bf16   Linear weight (transposed vs. torch)
    bl/g/beta  : (1, E_pad)  f32
    o_ref      : (B, E_pad)  f32
    """
    pooled = pooled_ref[:, 0, :].astype(jnp.bfloat16)        # (B, Cf), MXU-native
    y = jnp.dot(pooled, wl_ref[...], preferred_element_type=jnp.float32)
    y = y + bl_ref[...]                                      # (B, E_pad)
    # TODO(synk): BatchNorm1d running-stats update (momentum=0.01) is not
    # modeled; the forward uses batch statistics (train-mode behaviour).
    mu = jnp.mean(y, axis=0, keepdims=True)
    var = jnp.mean(jnp.square(y - mu), axis=0, keepdims=True)
    yhat = (y - mu) * lax.rsqrt(var + eps)
    o_ref[...] = (yhat * g_ref[...] + beta_ref[...]).astype(o_ref.dtype)


@functools.partial(jax.jit, static_argnames=("embed_size", "chunk"))
def encoder_cnn_forward(images, params, *, embed_size, chunk=None):
    """images: NCHW float32 (B, Cin, H, W) -> features (B, embed_size)."""
    B, Cin, H, W = images.shape
    HW = H * W

    # NCHW -> (B, Cin, HW): contiguous-trailing-dims reshape (no HBM transpose,
    # no wrapper-side dtype cast: the f32 pixel stream is DMA'd as-is).
    x3d = images.reshape(B, Cin, HW)

    if chunk is None:
        chunk = _choose_chunk(HW)
    assert HW % chunk == 0
    num_chunks = HW // chunk

    Cf = params["w_conv"].shape[0]
    E_pad = params["w_lin"].shape[1]          # already padded to multiple of 128

    # ---- kernel 1: streaming conv-trunk stand-in + global average pool ----
    pooled = pl.pallas_call(
        functools.partial(conv_pool_kernel, num_chunks=num_chunks, chunk=chunk,
                          inv_hw=1.0 / HW),
        out_shape=jax.ShapeDtypeStruct((B, 1, Cf), jnp.float32),
        grid_spec=pltpu.PrefetchScalarGridSpec(
            num_scalar_prefetch=0,
            grid=(B,),                        # one image per step, independent
            in_specs=[
                pl.BlockSpec((1, Cin, HW), lambda b: (b, 0, 0)),
                pl.BlockSpec((Cf, Cin), lambda b: (0, 0)),
                pl.BlockSpec((Cf, 1), lambda b: (0, 0)),
            ],
            out_specs=pl.BlockSpec((1, 1, Cf), lambda b: (b, 0, 0)),
            scratch_shapes=[pltpu.VMEM((Cf, 1), jnp.float32)],
        ),
        compiler_params=pltpu.CompilerParams(
            # Images are independent -> megacore / v7x 2-TC sharding is safe.
            dimension_semantics=("parallel",),
            # Default scoped VMEM is plenty at chunk<=512; raise vmem_limit_bytes
            # together with `chunk` on v6e if bigger slabs are wanted.
        ),
    )(x3d, params["w_conv"], params["b_conv"])

    # ---- kernel 2: Linear head + BatchNorm1d over the whole batch ----
    out = pl.pallas_call(
        functools.partial(linear_bn_kernel, eps=1e-5),
        out_shape=jax.ShapeDtypeStruct((B, E_pad), jnp.float32),
        grid_spec=pltpu.PrefetchScalarGridSpec(
            num_scalar_prefetch=0,
            grid=(1,),
            in_specs=[
                pl.BlockSpec((B, 1, Cf), lambda i: (0, 0, 0)),
                pl.BlockSpec((Cf, E_pad), lambda i: (0, 0)),
                pl.BlockSpec((1, E_pad), lambda i: (0, 0)),
                pl.BlockSpec((1, E_pad), lambda i: (0, 0)),
                pl.BlockSpec((1, E_pad), lambda i: (0, 0)),
            ],
            out_specs=pl.BlockSpec((B, E_pad), lambda i: (0, 0)),
        ),
        compiler_params=pltpu.CompilerParams(
            dimension_semantics=("arbitrary",),
        ),
    )(pooled, params["w_lin"], params["b_lin"], params["gamma"], params["beta"])

    return out[:, :embed_size]


def init_params(key, *, in_channels, feat_dim, embed_size):
    """Deterministic parameter init mirroring EncoderCNN.__init__/init_weights.

    Linear / BN parameters are zero/one-padded to a lane-dense width (multiple
    of 128); padded columns are sliced off after the kernel.
    """
    e_pad = _round_up(embed_size, 128)
    k_conv, k_lin = jax.random.split(key)

    # self.linear: weight ~ N(0, 0.02), bias = 0 (per init_weights)
    w_lin = jax.random.normal(k_lin, (feat_dim, embed_size), jnp.float32) * 0.02
    w_lin = jnp.pad(w_lin, ((0, 0), (0, e_pad - embed_size)))

    params = {
        # trunk stand-in (1x1 conv over channels): deterministic random, bias 0.
        # Stored bf16 so the in-kernel matmul is MXU-native.
        "w_conv": (jax.random.normal(k_conv, (feat_dim, in_channels), jnp.float32)
                   * 0.05).astype(jnp.bfloat16),
        "b_conv": jnp.zeros((feat_dim, 1), jnp.float32),
        # Linear weight stored bf16 (MXU-native); accumulation stays f32.
        "w_lin": w_lin.astype(jnp.bfloat16),
        "b_lin": jnp.zeros((1, e_pad), jnp.float32),
        # self.bn: gamma = 1, beta = 0 (PyTorch BatchNorm1d defaults)
        "gamma": jnp.ones((1, e_pad), jnp.float32),
        "beta": jnp.zeros((1, e_pad), jnp.float32),
    }
    return params


def reference_forward(images, params, *, embed_size):
    """Plain-JAX reference of the same computation (for a sanity check)."""
    B, Cin, H, W = images.shape
    x = images.reshape(B, Cin, H * W)
    xb = x.astype(jnp.bfloat16).astype(jnp.float32)          # kernel casts per chunk
    wc = params["w_conv"].astype(jnp.float32)                # (Cf, Cin)
    bc = params["b_conv"]                                    # (Cf, 1)
    f = jnp.einsum("fc,bcp->bfp", wc, xb) + bc[None]
    f = jnp.maximum(f, 0.0)                                  # (B, Cf, HW)
    pooled = f.mean(axis=2)                                  # (B, Cf)
    pooled_b = pooled.astype(jnp.bfloat16).astype(jnp.float32)
    y = pooled_b @ params["w_lin"].astype(jnp.float32) + params["b_lin"]
    mu = y.mean(axis=0, keepdims=True)
    var = ((y - mu) ** 2).mean(axis=0, keepdims=True)
    out = (y - mu) / jnp.sqrt(var + 1e-5) * params["gamma"] + params["beta"]
    return out[:, :embed_size]


if __name__ == "__main__":
    B, Cin, H, W = 2, 3, 16, 16      # small NCHW images
    feat_dim = 128                   # stands in for resnet.fc.in_features (2048)
    embed_size = 32

    key = jax.random.PRNGKey(0)
    k_img, k_par = jax.random.split(key)
    images = jax.random.normal(k_img, (B, Cin, H, W), jnp.float32)
    params = init_params(k_par, in_channels=Cin, feat_dim=feat_dim,
                         embed_size=embed_size)

    # chunk=128 -> 2 inner chunks per image: exercises the fused chunk loop.
    feats = encoder_cnn_forward(images, params, embed_size=embed_size, chunk=128)
    feats = jax.block_until_ready(feats)

    ref = reference_forward(images, params, embed_size=embed_size)
    np.testing.assert_allclose(np.asarray(feats), np.asarray(ref),
                               rtol=2e-2, atol=2e-2)
    assert feats.shape == (B, embed_size)
    print("KERNEL_OK")
</pallas_src>

<mosaic_0001>
module attributes {stable_mosaic.version = 11 : i64} {
  func.func @conv_pool_kernel(%arg0: i32, %arg1: memref<1x3x256xf32, #tpu.memory_space<vmem>>, %arg2: memref<128x3xbf16, #tpu.memory_space<vmem>>, %arg3: memref<128x1xf32, #tpu.memory_space<vmem>>, %arg4: memref<1x1x128xf32, #tpu.memory_space<vmem>>, %arg5: memref<128x1xf32, #tpu.memory_space<vmem>>) attributes {dimension_semantics = [#tpu.dimension_semantics<parallel>], iteration_bounds = array<i64: 2>, scalar_prefetch = 0 : i64, scratch_operands = 1 : i64, tpu.core_type = #tpu.core_type<tc>, window_params = [{transform_indices = @transform_0, window_bounds = array<i64: 1, 3, 256>}, {pipeline_mode = #tpu.pipeline_mode<synchronous>, transform_indices = @transform_1, window_bounds = array<i64: 128, 3>}, {pipeline_mode = #tpu.pipeline_mode<synchronous>, transform_indices = @transform_2, window_bounds = array<i64: 128, 1>}, {transform_indices = @transform_3, window_bounds = array<i64: 1, 1, 128>}]} {
    %cst = arith.constant 0.000000e+00 : f32
    %0 = vector.broadcast %cst : f32 to vector<128x1xf32>
    %c0 = arith.constant 0 : index
    %c0_0 = arith.constant 0 : index
    %1 = vector.load %arg5[%c0, %c0_0] : memref<128x1xf32, #tpu.memory_space<vmem>>, vector<128x1xf32>
    tpu.vector_store %arg5[%c0, %c0_0], %0 {strides = array<i32>} : memref<128x1xf32, #tpu.memory_space<vmem>>, vector<128x1xf32>,
    %c0_1 = arith.constant 0 : index
    %c0_2 = arith.constant 0 : index
    %2 = vector.load %arg2[%c0_1, %c0_2] : memref<128x3xbf16, #tpu.memory_space<vmem>>, vector<128x3xbf16>
    %c0_3 = arith.constant 0 : index
    %c0_4 = arith.constant 0 : index
    %3 = vector.load %arg3[%c0_3, %c0_4] : memref<128x1xf32, #tpu.memory_space<vmem>>, vector<128x1xf32>
    %c0_i32 = arith.constant 0 : i32
    %c128_i32 = arith.constant 128 : i32
    %4 = arith.muli %c0_i32, %c128_i32 : i32
    %5 = tpu.assume_multiple %4, 128 : i32
    %c0_5 = arith.constant 0 : index
    %c0_6 = arith.constant 0 : index
    %6 = arith.index_cast %5 : i32 to index
    %7 = vector.load %arg1[%c0_5, %c0_6, %6] : memref<1x3x256xf32, #tpu.memory_space<vmem>>, vector<1x3x128xf32>
    %8 = vector.shape_cast %7 : vector<1x3x128xf32> to vector<3x128xf32>
    %9 = arith.truncf %8 : vector<3x128xf32> to vector<3x128xbf16>
    %cst_7 = arith.constant dense<0.000000e+00> : vector<128x128xf32>
    %10 = tpu.matmul %2, %9, %cst_7 {dimension_numbers = #tpu.dot_dimension_numbers<[1], [0], [0], [1], [0, 0, 1, 1], [], []>} : vector<128x3xbf16>, vector<3x128xbf16>, vector<128x128xf32> -> vector<128x128xf32>
    %11 = vector.broadcast %3 : vector<128x1xf32> to vector<128x128xf32>
    %12 = arith.addf %10, %11 : vector<128x128xf32>
    %cst_8 = arith.constant 0.000000e+00 : f32
    %13 = vector.broadcast %cst_8 : f32 to vector<128x128xf32>
    %14 = arith.maximumf %12, %13 : vector<128x128xf32>
    %c0_9 = arith.constant 0 : index
    %c0_10 = arith.constant 0 : index
    %15 = vector.load %arg5[%c0_9, %c0_10] : memref<128x1xf32, #tpu.memory_space<vmem>>, vector<128x1xf32>
    %cst_11 = arith.constant dense<0.000000e+00> : vector<128xf32>
    %16 = vector.multi_reduction <add>, %14, %cst_11 [1] : vector<128x128xf32> to vector<128xf32>
    %17 = vector.shape_cast %16 : vector<128xf32> to vector<128x1xf32>
    %18 = arith.addf %15, %17 : vector<128x1xf32>
    %c0_12 = arith.constant 0 : index
    %c0_13 = arith.constant 0 : index
    %19 = vector.load %arg5[%c0_12, %c0_13] : memref<128x1xf32, #tpu.memory_space<vmem>>, vector<128x1xf32>
    tpu.vector_store %arg5[%c0_12, %c0_13], %18 {strides = array<i32>} : memref<128x1xf32, #tpu.memory_space<vmem>>, vector<128x1xf32>,
    %c1_i32 = arith.constant 1 : i32
    %c128_i32_14 = arith.constant 128 : i32
    %20 = arith.muli %c1_i32, %c128_i32_14 : i32
    %21 = tpu.assume_multiple %20, 128 : i32
    %c0_15 = arith.constant 0 : index
    %c0_16 = arith.constant 0 : index
    %22 = arith.index_cast %21 : i32 to index
    %23 = vector.load %arg1[%c0_15, %c0_16, %22] : memref<1x3x256xf32, #tpu.memory_space<vmem>>, vector<1x3x128xf32>
    %24 = vector.shape_cast %23 : vector<1x3x128xf32> to vector<3x128xf32>
    %25 = arith.truncf %24 : vector<3x128xf32> to vector<3x128xbf16>
    %cst_17 = arith.constant dense<0.000000e+00> : vector<128x128xf32>
    %26 = tpu.matmul %2, %25, %cst_17 {dimension_numbers = #tpu.dot_dimension_numbers<[1], [0], [0], [1], [0, 0, 1, 1], [], []>} : vector<128x3xbf16>, vector<3x128xbf16>, vector<128x128xf32> -> vector<128x128xf32>
    %27 = vector.broadcast %3 : vector<128x1xf32> to vector<128x128xf32>
    %28 = arith.addf %26, %27 : vector<128x128xf32>
    %cst_18 = arith.constant 0.000000e+00 : f32
    %29 = vector.broadcast %cst_18 : f32 to vector<128x128xf32>
    %30 = arith.maximumf %28, %29 : vector<128x128xf32>
    %c0_19 = arith.constant 0 : index
    %c0_20 = arith.constant 0 : index
    %31 = vector.load %arg5[%c0_19, %c0_20] : memref<128x1xf32, #tpu.memory_space<vmem>>, vector<128x1xf32>
    %cst_21 = arith.constant dense<0.000000e+00> : vector<128xf32>
    %32 = vector.multi_reduction <add>, %30, %cst_21 [1] : vector<128x128xf32> to vector<128xf32>
    %33 = vector.shape_cast %32 : vector<128xf32> to vector<128x1xf32>
    %34 = arith.addf %31, %33 : vector<128x1xf32>
    %c0_22 = arith.constant 0 : index
    %c0_23 = arith.constant 0 : index
    %35 = vector.load %arg5[%c0_22, %c0_23] : memref<128x1xf32, #tpu.memory_space<vmem>>, vector<128x1xf32>
    tpu.vector_store %arg5[%c0_22, %c0_23], %34 {strides = array<i32>} : memref<128x1xf32, #tpu.memory_space<vmem>>, vector<128x1xf32>,
    %c2_i32 = arith.constant 2 : i32
    %c0_24 = arith.constant 0 : index
    %c0_25 = arith.constant 0 : index
    %36 = vector.load %arg5[%c0_24, %c0_25] : memref<128x1xf32, #tpu.memory_space<vmem>>, vector<128x1xf32>
    %cst_26 = arith.constant 3.906250e-03 : f32
    %37 = vector.broadcast %cst_26 : f32 to vector<128x1xf32>
    %38 = arith.mulf %36, %37 : vector<128x1xf32>
    %39 = vector.shape_cast %38 : vector<128x1xf32> to vector<1x1x128xf32>
    %c0_27 = arith.constant 0 : index
    %c0_28 = arith.constant 0 : index
    %c0_29 = arith.constant 0 : index
    %40 = vector.load %arg4[%c0_27, %c0_28, %c0_29] : memref<1x1x128xf32, #tpu.memory_space<vmem>>, vector<1x1x128xf32>
    tpu.vector_store %arg4[%c0_27, %c0_28, %c0_29], %39 {strides = array<i32>} : memref<1x1x128xf32, #tpu.memory_space<vmem>>, vector<1x1x128xf32>,
    return
  }
  func.func @transform_0(%arg0: i32) -> (i32, i32, i32) {
    %c0_i32 = arith.constant 0 : i32
    %c0_i32_0 = arith.constant 0 : i32
    %c0_i32_1 = arith.constant 0 : i32
    return %arg0, %c0_i32, %c0_i32_0 : i32, i32, i32
  }
  func.func @transform_1(%arg0: i32) -> (i32, i32) {
    %c0_i32 = arith.constant 0 : i32
    %c0_i32_0 = arith.constant 0 : i32
    %c0_i32_1 = arith.constant 0 : i32
    return %c0_i32, %c0_i32_0 : i32, i32
  }
  func.func @transform_2(%arg0: i32) -> (i32, i32) {
    %c0_i32 = arith.constant 0 : i32
    %c0_i32_0 = arith.constant 0 : i32
    %c0_i32_1 = arith.constant 0 : i32
    return %c0_i32, %c0_i32_0 : i32, i32
  }
  func.func @transform_3(%arg0: i32) -> (i32, i32, i32) {
    %c0_i32 = arith.constant 0 : i32
    %c0_i32_0 = arith.constant 0 : i32
    %c0_i32_1 = arith.constant 0 : i32
    return %arg0, %c0_i32, %c0_i32_0 : i32, i32, i32
  }
}

module attributes {stable_mosaic.version = 11 : i64} {
  func.func @linear_bn_kernel(%arg0: i32, %arg1: memref<2x1x128xf32, #tpu.memory_space<vmem>>, %arg2: memref<128x128xbf16, #tpu.memory_space<vmem>>, %arg3: memref<1x128xf32, #tpu.memory_space<vmem>>, %arg4: memref<1x128xf32, #tpu.memory_space<vmem>>, %arg5: memref<1x128xf32, #tpu.memory_space<vmem>>, %arg6: memref<2x128xf32, #tpu.memory_space<vmem>>) attributes {dimension_semantics = [#tpu.dimension_semantics<arbitrary>], iteration_bounds = array<i64: 1>, scalar_prefetch = 0 : i64, scratch_operands = 0 : i64, tpu.core_type = #tpu.core_type<tc>, window_params = [{pipeline_mode = #tpu.pipeline_mode<synchronous>, transform_indices = @transform_0, window_bounds = array<i64: 2, 1, 128>}, {pipeline_mode = #tpu.pipeline_mode<synchronous>, transform_indices = @transform_1, window_bounds = array<i64: 128, 128>}, {pipeline_mode = #tpu.pipeline_mode<synchronous>, transform_indices = @transform_2, window_bounds = array<i64: 1, 128>}, {pipeline_mode = #tpu.pipeline_mode<synchronous>, transform_indices = @transform_3, window_bounds = array<i64: 1, 128>}, {pipeline_mode = #tpu.pipeline_mode<synchronous>, transform_indices = @transform_4, window_bounds = array<i64: 1, 128>}, {pipeline_mode = #tpu.pipeline_mode<synchronous>, transform_indices = @transform_5, window_bounds = array<i64: 2, 128>}]} {
    %c0 = arith.constant 0 : index
    %c0_0 = arith.constant 0 : index
    %c0_1 = arith.constant 0 : index
    %0 = vector.load %arg1[%c0, %c0_0, %c0_1] : memref<2x1x128xf32, #tpu.memory_space<vmem>>, vector<2x1x128xf32>
    %1 = vector.shape_cast %0 : vector<2x1x128xf32> to vector<2x128xf32>
    %2 = arith.truncf %1 : vector<2x128xf32> to vector<2x128xbf16>
    %c0_2 = arith.constant 0 : index
    %c0_3 = arith.constant 0 : index
    %3 = vector.load %arg2[%c0_2, %c0_3] : memref<128x128xbf16, #tpu.memory_space<vmem>>, vector<128x128xbf16>
    %cst = arith.constant dense<0.000000e+00> : vector<2x128xf32>
    %4 = tpu.matmul %2, %3, %cst {dimension_numbers = #tpu.dot_dimension_numbers<[1], [0], [0], [1], [0, 0, 1, 1], [], []>} : vector<2x128xbf16>, vector<128x128xbf16>, vector<2x128xf32> -> vector<2x128xf32>
    %c0_4 = arith.constant 0 : index
    %c0_5 = arith.constant 0 : index
    %5 = vector.load %arg3[%c0_4, %c0_5] : memref<1x128xf32, #tpu.memory_space<vmem>>, vector<1x128xf32>
    %6 = vector.broadcast %5 : vector<1x128xf32> to vector<2x128xf32>
    %7 = arith.addf %4, %6 : vector<2x128xf32>
    %cst_6 = arith.constant dense<0.000000e+00> : vector<128xf32>
    %8 = vector.multi_reduction <add>, %7, %cst_6 [0] : vector<2x128xf32> to vector<128xf32>
    %9 = vector.shape_cast %8 : vector<128xf32> to vector<1x128xf32>
    %cst_7 = arith.constant 2.000000e+00 : f32
    %10 = vector.broadcast %cst_7 : f32 to vector<1x128xf32>
    %11 = arith.divf %9, %10 : vector<1x128xf32>
    %12 = vector.broadcast %11 : vector<1x128xf32> to vector<2x128xf32>
    %13 = arith.subf %7, %12 : vector<2x128xf32>
    %14 = arith.mulf %13, %13 : vector<2x128xf32>
    %cst_8 = arith.constant dense<0.000000e+00> : vector<128xf32>
    %15 = vector.multi_reduction <add>, %14, %cst_8 [0] : vector<2x128xf32> to vector<128xf32>
    %16 = vector.shape_cast %15 : vector<128xf32> to vector<1x128xf32>
    %cst_9 = arith.constant 2.000000e+00 : f32
    %17 = vector.broadcast %cst_9 : f32 to vector<1x128xf32>
    %18 = arith.divf %16, %17 : vector<1x128xf32>
    %19 = vector.broadcast %11 : vector<1x128xf32> to vector<2x128xf32>
    %20 = arith.subf %7, %19 : vector<2x128xf32>
    %cst_10 = arith.constant 9.99999974E-6 : f32
    %21 = vector.broadcast %cst_10 : f32 to vector<1x128xf32>
    %22 = arith.addf %18, %21 : vector<1x128xf32>
    %23 = math.rsqrt %22 : vector<1x128xf32>
    %24 = vector.broadcast %23 : vector<1x128xf32> to vector<2x128xf32>
    %25 = arith.mulf %20, %24 : vector<2x128xf32>
    %c0_11 = arith.constant 0 : index
    %c0_12 = arith.constant 0 : index
    %26 = vector.load %arg4[%c0_11, %c0_12] : memref<1x128xf32, #tpu.memory_space<vmem>>, vector<1x128xf32>
    %27 = vector.broadcast %26 : vector<1x128xf32> to vector<2x128xf32>
    %28 = arith.mulf %25, %27 : vector<2x128xf32>
    %c0_13 = arith.constant 0 : index
    %c0_14 = arith.constant 0 : index
    %29 = vector.load %arg5[%c0_13, %c0_14] : memref<1x128xf32, #tpu.memory_space<vmem>>, vector<1x128xf32>
    %30 = vector.broadcast %29 : vector<1x128xf32> to vector<2x128xf32>
    %31 = arith.addf %28, %30 : vector<2x128xf32>
    %c0_15 = arith.constant 0 : index
    %c0_16 = arith.constant 0 : index
    %32 = vector.load %arg6[%c0_15, %c0_16] : memref<2x128xf32, #tpu.memory_space<vmem>>, vector<2x128xf32>
    tpu.vector_store %arg6[%c0_15, %c0_16], %31 {strides = array<i32>} : memref<2x128xf32, #tpu.memory_space<vmem>>, vector<2x128xf32>,
    return
  }
  func.func @transform_0(%arg0: i32) -> (i32, i32, i32) {
    %c0_i32 = arith.constant 0 : i32
    %c0_i32_0 = arith.constant 0 : i32
    %c0_i32_1 = arith.constant 0 : i32
    %c0_i32_2 = arith.constant 0 : i32
    return %c0_i32, %c0_i32_0, %c0_i32_1 : i32, i32, i32
  }
  func.func @transform_1(%arg0: i32) -> (i32, i32) {
    %c0_i32 = arith.constant 0 : i32
    %c0_i32_0 = arith.constant 0 : i32
    %c0_i32_1 = arith.constant 0 : i32
    return %c0_i32, %c0_i32_0 : i32, i32
  }
  func.func @transform_2(%arg0: i32) -> (i32, i32) {
    %c0_i32 = arith.constant 0 : i32
    %c0_i32_0 = arith.constant 0 : i32
    %c0_i32_1 = arith.constant 0 : i32
    return %c0_i32, %c0_i32_0 : i32, i32
  }
  func.func @transform_3(%arg0: i32) -> (i32, i32) {
    %c0_i32 = arith.constant 0 : i32
    %c0_i32_0 = arith.constant 0 : i32
    %c0_i32_1 = arith.constant 0 : i32
    return %c0_i32, %c0_i32_0 : i32, i32
  }
  func.func @transform_4(%arg0: i32) -> (i32, i32) {
    %c0_i32 = arith.constant 0 : i32
    %c0_i32_0 = arith.constant 0 : i32
    %c0_i32_1 = arith.constant 0 : i32
    return %c0_i32, %c0_i32_0 : i32, i32
  }
  func.func @transform_5(%arg0: i32) -> (i32, i32) {
    %c0_i32 = arith.constant 0 : i32
    %c0_i32_0 = arith.constant 0 : i32
    %c0_i32_1 = arith.constant 0 : i32
    return %c0_i32, %c0_i32_0 : i32, i32
  }
}

</mosaic_0001>

<bundles_post_ra>
// kernel: encoder_cnn_forward.3
= control target key start
LH: loop header
LB: loop body
LE: loop exit
PB: predicated region body
PF: predicated region fallthrough
CT: control target
= control target key end

     0   :  { %v275_v1 = vmov 0.0   ;;  %vm276_vm0 = vmmov 0   ;;  %s350_s0 = inlined_call_operand.vmem [shape: f32[2,1,128], index: 0, kind: input, shape index: {}]   ;;  %s351_s1 = inlined_call_operand.vmem [shape: bf16[128,128], index: 1, kind: input, shape index: {}]   ;;  %s352_s2 = inlined_call_operand.vmem [shape: f32[1,128], index: 2, kind: input, shape index: {}]   ;;  %s353_s3 = inlined_call_operand.vmem [shape: f32[1,128], index: 3, kind: input, shape index: {}]   ;;  %s354_s4 = inlined_call_operand.vmem [shape: f32[1,128], index: 4, kind: input, shape index: {}]   ;;  %s355_s5 = inlined_call_operand.hbm [shape: f32[2,128], index: 5, kind: output, shape index: {}]  }
   0x1   :  { %v243_v0 = vld [vmem:[%s351_s1 + $0x38] sm:$0xff]   ;;  %220 = vmatprep.subr.bf16.mxu0 %v275_v1  ;;  %v244_v2 = vld [vmem:[%s351_s1 + $0x30] sm:$0xff]   ;;  %236 = vmatprep.mubr.msk.bf16.mxu0 %vm276_vm0, %v275_v1  ;;  %v245_v3 = vld [vmem:[%s351_s1 + $0x28] sm:$0xff]  }
   0x2   :  { %221 = vmatpush3.bf16.msra.mxu0 %v243_v0 }
   0x3   :  { %222 = vmatprep.subr.bf16.mxu0 %v275_v1 }
   0x6   :  { %223 = vmatpush3.bf16.msra.mxu0 %v244_v2 }
   0x7   :  { %224 = vmatprep.subr.bf16.mxu0 %v275_v1 }
   0x8   :  { %10 = vsyncpa [#allocation3], 0  ;;  %v246_v4 = vld [vmem:[%s351_s1 + $0x20] sm:$0xff]   ;;  %v247_v6 = vld [vmem:[%s351_s1 + $0x18] sm:$0xff]   ;;  %vm54_vm1 = vcmask 1041409   ;;  %vm146_vm2 = vcmask 1041408  }
   0x9   :  { %v23_v5 = vld [vmem:[%s350_s0 + $0x1] sm:$0x1]  ;;  %v22_v8 = vld [vmem:[%s350_s0] sm:$0x1]  ;;  %v248_v9 = vld [vmem:[%s351_s1 + $0x10] sm:$0xff]   ;;  %s277_s16 = smov [#allocation2]  }
   0xa   :  { %225 = vmatpush3.bf16.msra.mxu0 %v245_v3  ;;  %v25_v7 = vpack.c.bf16 %v23_v5, %v23_v5  ;;  %v24_v10 = vpack.c.bf16 %v22_v8, %v22_v8  ;;  %v249_v12 = vld [vmem:[%s351_s1 + $0x8] sm:$0xff]   ;;  %v250_v15 = vld [vmem:[%s351_s1] sm:$0xff]   ;;  %s192_s17 = sshll.u32 %s277_s16, 4  ;;  %s193_s17 = int_to_ptr.vmem [resolvable:$true] %s192_s17 }
   0xb   :  { %226 = vmatprep.subr.bf16.mxu0 %v275_v1  ;;  %v200_v18 = vld [vmem:[%s352_s2] ss:$0 sm:$0xff]  ;;  %s253_s18 = scalar_lea.vmem %s193_s17, 32  ;;  %p258_p1 = scmp.lt.s32.totalorder %s193_s17, %s193_s17 }
   0xc   :  { %v52_v11 = vunpack.c.l.b16 %v25_v7  ;;  %v51_v13 = vunpack.c.l.b16 %v24_v10  ;;  %v209_v44 = vld [vmem:[%s353_s3] ss:$0 sm:$0xff]  ;;  %p254_p0 = scmp.ne.s32.totalorder %s193_s17, %s253_s18  ;;  %p259_p2 = scmp.lt.s32.totalorder %s253_s18, %s253_s18 }
   0xd   :  { %v210_v46 = vld [vmem:[%s354_s4] ss:$0 sm:$0xff] }
   0xe   :  { %227 = vmatpush3.bf16.msra.mxu0 %v246_v4  ;;  %v53_v14 = vrot.slane %v52_v11, 7  ;;  %p260_p3 = por %p259_p2, %p258_p1 }
   0xf   :  { %228 = vmatprep.subr.bf16.mxu0 %v275_v1 }
  0x10   :  { %v55_v16 = vsel %vm54_vm1, %v53_v14, %v51_v13  ;;  %p261_p4 = pnand %p260_p3, %p254_p0 }
  0x11   :  { %v56_v17 = vpack.c.b16 %v55_v16, %v55_v16 }
  0x12   :  { %229 = vmatpush3.bf16.msra.mxu0 %v247_v6 }
  0x13   :  { %230 = vmatprep.subr.bf16.mxu0 %v275_v1 }
  0x16   :  { %231 = vmatpush3.bf16.msra.mxu0 %v248_v9 }
  0x17   :  { %232 = vmatprep.subr.bf16.mxu0 %v275_v1 }
  0x1a   :  { %233 = vmatpush3.bf16.msra.mxu0 %v249_v12 }
  0x1b   :  { %234 = vmatprep.subr.bf16.mxu0 %v275_v1 }
  0x1e   :  { %235 = vmatpush3.bf16.msra.mxu0 %v250_v15 }
  0x21   :  { %237 = vmatmul.mubr.bf16.vlgmr.msra.gmra.mxu0 %v56_v17 }
  0xe1   :  { %v140_v19 = vpop.f32.mrf.mxu0 }
  0xe2   :  { %v141_v20 = vadd.f32 %v200_v18, %v140_v19 }
  0xe3   :  { %v238_v21 = vpop.f32.mrf.mxu0 }
  0xe4   :  { %v147_v22 = vsel %vm146_vm2, %v141_v20, 0.0 }
  0xe5   :  { %v148_v23 = vrot.slane %v147_v22, 4  ;;  %v143_v24 = vpop.f32.mrf.mxu0 }
  0xe7   :  { %v149_v25 = vadd.f32 %v148_v23, %v147_v22  ;;  %v239_v26 = vpop.f32.mrf.mxu0 }
  0xe9   :  { %v150_v27 = vrot.slane %v149_v25, 2 }
  0xeb   :  { %v151_v28 = vadd.f32 %v150_v27, %v149_v25 }
  0xed   :  { %v152_v29 = vrot.slane %v151_v28, 1 }
  0xef   :  { %v153_v30 = vadd.f32 %v152_v29, %v151_v28 }
  0xf1   :  { %v155_v31 = vmul.f32 0.5, %v153_v30 }
  0xf3   :  { %v156_v32 = vsub.f32 %v141_v20, %v155_v31 }
  0xf5   :  { %v157_v33 = vmul.f32 %v156_v32, %v156_v32 }
  0xf7   :  { %v158_v34 = vsel %vm146_vm2, %v157_v33, 0.0 }
  0xf8   :  { %v159_v35 = vrot.slane %v158_v34, 4 }
  0xfa   :  { %v160_v36 = vadd.f32 %v159_v35, %v158_v34 }
  0xfc   :  { %v161_v37 = vrot.slane %v160_v36, 2 }
  0xfe   :  { %v162_v38 = vadd.f32 %v161_v37, %v160_v36 }
 0x100   :  { %v163_v39 = vrot.slane %v162_v38, 1 }
 0x102   :  { %v164_v40 = vadd.f32 %v163_v39, %v162_v38 }
 0x104   :  { %v165_v41 = vmul.f32 0.5, %v164_v40 }
 0x106   :  { %v166_v42 = vadd.f32 1e-05, %v165_v41 }
 0x108   :  { %251 = vrsqrt.f32 %v166_v42 }
 0x115   :  { %v252_v43 = vpop.eup %251 }
 0x116   :  { %v168_v45 = vmul.f32 %v252_v43, %v156_v32 }
 0x118   :  { %v176_v47 = vmul.f32 %v209_v44, %v168_v45 }
 0x11a   :  { %v184_v48 = vadd.f32 %v210_v46, %v176_v47 }
 0x11c   :  { %185 = vst [vmem:[#allocation2] sm:$0x3] %v184_v48 }
 0x11d   :  { %264 = shalt.err (!%p261_p4)
}
 0x11e   :  { %195 = dma.vmem_to_hbm [thread:$0]  %s193_s17, 32, %s355_s5, [#allocation3]  }
 0x11f   :  { %273 = dma.done.wait [#allocation3], 32  }
 0x120   :  { %274 = vsyncadd [#allocation3], 4294967264 }
 0x121   :  { %199 = vsyncpa [#allocation3], 1 }

// kernel: encoder_cnn_forward.2
= control target key start
LH: loop header
LB: loop body
LE: loop exit
PB: predicated region body
PF: predicated region fallthrough
CT: control target
= control target key end

     0   :  { %s1160_s12 = smov 0   ;;  %s1365_s0 = inlined_call_operand.vmem [shape: f32[2,3,256], index: 0, kind: input, shape index: {}]   ;;  %s1366_s1 = inlined_call_operand.vmem [shape: bf16[128,3], index: 1, kind: input, shape index: {}]   ;;  %s1367_s2 = inlined_call_operand.vmem [shape: f32[128,1], index: 2, kind: input, shape index: {}]   ;;  %s1368_s3 = inlined_call_operand.vmem [shape: f32[2,1,128], index: 3, kind: output, shape index: {}]  }
   0x1 LB: > { %s1019_s13 = sadd.s32 4294967295, %s1135_s12   ;;  %p1023_p0 = scmp.ge.s32.totalorder %s1135_s12, 1  ;;  %s1135_s12 = sphi %s1160_s12, %s13_s12  }
   0x2   : > { %p137_p1 = scmp.lt.s32.totalorder %s1135_s12, 3 }
   0x4   : > { %p138_p2 = pnand %p1023_p0, %p137_p1 }
   0x5   : > { %p159_p3 = scmp.lt.s32.totalorder (!%p138_p2), %s1019_s13, 1 }
   0x6   : > { %141 = sbr.rel (%p138_p2) target bundleno = 566 (0x236), region = 32 }
   0xb   : > { %vm364_vm0 = vcmask 1040384   ;;  %vm365_vm1 = vcmask 1041408   ;;  %v1121_v0 = vld [vmem:[%s1366_s1] sm:$0xff]   ;;  %vm339_vm2 = vcmask 23552   ;;  %s1370_s13 = smov (!%p159_p3, %s1019_s13), 1  ;;  %v1137_v1 = vmov 65535  }
   0xc   : > { %v366_v2 = vsel %vm364_vm0, 4294967295, %v1137_v1  ;;  %1074 = vmatprep.mubr.msk.bf16.mxu0 %vm339_vm2, %v1121_v0  ;;  %1092 = vmatprep.mubr.msk.bf16.mxu1 %vm339_vm2, %v1121_v0  ;;  %s1053_s16 = sshll.u32 %s1370_s13, 3  ;;  %v1138_v3 = vmov 0   ;;  %v203_v11 = vld [vmem:[%s1367_s2 + $0x10] sm:$0xff]  ;;  %v201_v12 = vld [vmem:[%s1367_s2] sm:$0xff]  ;;  %v1122_v13 = vld [vmem:[%s1366_s1 + $0x8] sm:$0xff]   ;;  %s166_s18 = scalar_lea.vmem %s1368_s3, %s1370_s13 }
   0xd   : > { %1120 = vset.pattern.permute.xlu1 %v1138_v3  ;;  %1119 = vset.pattern.permute.xlu0 %v1138_v3  ;;  %s163_s19 = scalar_lea.vmem %s1365_s0, %s1053_s16  ;;  %v367_v4 = vsel %vm365_vm1, %v366_v2, 0  ;;  %v204_v14 = vld [vmem:[%s1367_s2 + $0x18] sm:$0xff]  ;;  %v1123_v15 = vld [vmem:[%s1366_s1 + $0x10] sm:$0xff]   ;;  %v202_v16 = vld [vmem:[%s1367_s2 + $0x8] sm:$0xff]  ;;  %vm168_vm3 = vcmask 7168   ;;  %v1139_v34 = vmov 0.0  }
   0xe   : > { %v217_v5 = vld [vmem:[%s163_s19] sm:$0x7]  ;;  %v1042_v6 = vld [vmem:[%s163_s19 + $0x4] sm:$0x7]  ;;  %231 = vperm.xlu1 %1120, %v203_v11   ;;  %221 = vperm.xlu0 %1119, %v201_v12   ;;  %v206_v17 = vld [vmem:[%s1367_s2 + $0x28] sm:$0xff]  ;;  %171 = vst.msk [vmem:[#allocation2 + $0x10] sm:$0xff] %vm168_vm3, %v1139_v34 }
   0xf   : > { %v218_v7 = vpack.c.bf16 %v217_v5, %v217_v5  ;;  %v566_v8 = vpack.c.bf16 %v1042_v6, %v1042_v6  ;;  %v205_v18 = vld [vmem:[%s1367_s2 + $0x20] sm:$0xff]  ;;  %v1124_v19 = vld [vmem:[%s1366_s1 + $0x18] sm:$0xff]   ;;  %v207_v22 = vld [vmem:[%s1367_s2 + $0x30] sm:$0xff]  ;;  %169 = vst.msk [vmem:[#allocation2] sm:$0xff] %vm168_vm3, %v1139_v34  ;;  %vm870_vm4 = vcmask 130112   ;;  %vm877_vm5 = vcmask 195712  }
  0x10   : > { %v208_v20 = vld [vmem:[%s1367_s2 + $0x38] sm:$0xff]  ;;  %v1125_v21 = vld [vmem:[%s1366_s1 + $0x20] sm:$0xff]   ;;  %v210_v23 = vld [vmem:[%s1367_s2 + $0x48] sm:$0xff]  ;;  %170 = vst.msk [vmem:[#allocation2 + $0x8] sm:$0xff] %vm168_vm3, %v1139_v34  ;;  %vm884_vm6 = vcmask 261312   ;;  %vm891_vm7 = vcmask 326912  }
  0x11   : > { %v369_v9 = vand.u32 %v367_v4, %v218_v7  ;;  %v568_v10 = vand.u32 %v566_v8, %v367_v4  ;;  %v209_v24 = vld [vmem:[%s1367_s2 + $0x40] sm:$0xff]  ;;  %v1126_v25 = vld [vmem:[%s1366_s1 + $0x28] sm:$0xff]   ;;  %v212_v26 = vld [vmem:[%s1367_s2 + $0x58] sm:$0xff]  ;;  %172 = vst.msk [vmem:[#allocation2 + $0x18] sm:$0xff] %vm168_vm3, %v1139_v34  ;;  %vm898_vm8 = vcmask 392512   ;;  %vm905_vm9 = vcmask 458112  }
  0x12   : > { %236 = vperm.xlu1 %1120, %v204_v14   ;;  %226 = vperm.xlu0 %1119, %v202_v16   ;;  %v1127_v27 = vld [vmem:[%s1366_s1 + $0x30] sm:$0xff]   ;;  %v214_v29 = vld [vmem:[%s1367_s2 + $0x68] sm:$0xff]  ;;  %v213_v30 = vld [vmem:[%s1367_s2 + $0x60] sm:$0xff]  ;;  %173 = vst.msk [vmem:[#allocation2 + $0x20] sm:$0xff] %vm168_vm3, %v1139_v34  ;;  %vm912_vm10 = vcmask 523712   ;;  %vm919_vm11 = vcmask 589312  }
  0x13   : > { %1072 = vmatprep.subr.bf16.mxu0 %v369_v9  ;;  %1090 = vmatprep.subr.bf16.mxu1 %v568_v10  ;;  %v211_v28 = vld [vmem:[%s1367_s2 + $0x50] sm:$0xff]  ;;  %v1128_v31 = vld [vmem:[%s1366_s1 + $0x38] sm:$0xff]   ;;  %174 = vst.msk [vmem:[#allocation2 + $0x28] sm:$0xff] %vm168_vm3, %v1139_v34  ;;  %175 = vst.msk [vmem:[#allocation2 + $0x30] sm:$0xff] %vm168_vm3, %v1139_v34  ;;  %vm926_vm12 = vcmask 654912   ;;  %vm933_vm13 = vcmask 720512  }
  0x14   : > { %1073 = vmatpush3.bf16.msra.mxu0 %v369_v9  ;;  %1091 = vmatpush3.bf16.msra.mxu1 %v568_v10  ;;  %v216_v32 = vld [vmem:[%s1367_s2 + $0x78] sm:$0xff]  ;;  %v215_v33 = vld [vmem:[%s1367_s2 + $0x70] sm:$0xff]  ;;  %176 = vst.msk [vmem:[#allocation2 + $0x38] sm:$0xff] %vm168_vm3, %v1139_v34  ;;  %177 = vst.msk [vmem:[#allocation2 + $0x40] sm:$0xff] %vm168_vm3, %v1139_v34  ;;  %vm940_vm14 = vcmask 786112   ;;  %vm947_vm15 = vcmask 851712  }
  0x15   : > { %178 = vst.msk [vmem:[#allocation2 + $0x48] sm:$0xff] %vm168_vm3, %v1139_v34  ;;  %179 = vst.msk [vmem:[#allocation2 + $0x50] sm:$0xff] %vm168_vm3, %v1139_v34  ;;  %vm954_vm0 = vcmask 917312   ;;  %vm961_vm1 = vcmask 982912  }
  0x16   : > { %246 = vperm.xlu1 %1120, %v206_v17   ;;  %241 = vperm.xlu0 %1119, %v205_v18   ;;  %180 = vst.msk [vmem:[#allocation2 + $0x58] sm:$0xff] %vm168_vm3, %v1139_v34  ;;  %181 = vst.msk [vmem:[#allocation2 + $0x60] sm:$0xff] %vm168_vm3, %v1139_v34 }
  0x17   : > { %1075 = vmatmul.mubr.msk.bf16.vlgmr.msra.gmra.mxu0 %vm339_vm2, %v1122_v13  ;;  %1093 = vmatmul.mubr.msk.bf16.vlgmr.msra.gmra.mxu1 %vm339_vm2, %v1122_v13  ;;  %182 = vst.msk [vmem:[#allocation2 + $0x68] sm:$0xff] %vm168_vm3, %v1139_v34  ;;  %183 = vst.msk [vmem:[#allocation2 + $0x70] sm:$0xff] %vm168_vm3, %v1139_v34 }
  0x18   : > { %1078 = vmatprep.mubr.msk.bf16.mxu0 %vm339_vm2, %v1123_v15  ;;  %1096 = vmatprep.mubr.msk.bf16.mxu1 %vm339_vm2, %v1123_v15  ;;  %184 = vst.msk [vmem:[#allocation2 + $0x78] sm:$0xff] %vm168_vm3, %v1139_v34 }
  0x1a   : > { %256 = vperm.xlu1 %1120, %v208_v20   ;;  %251 = vperm.xlu0 %1119, %v207_v22  }
  0x1e   : > { %266 = vperm.xlu1 %1120, %v210_v23   ;;  %261 = vperm.xlu0 %1119, %v209_v24  }
  0x1f   : > { %1079 = vmatmul.mubr.msk.bf16.gmra.mxu0 %vm339_vm2, %v1124_v19  ;;  %1097 = vmatmul.mubr.msk.bf16.gmra.mxu1 %vm339_vm2, %v1124_v19 }
  0x20   : > { %1082 = vmatprep.mubr.msk.bf16.mxu0 %vm339_vm2, %v1125_v21  ;;  %1100 = vmatprep.mubr.msk.bf16.mxu1 %vm339_vm2, %v1125_v21 }
  0x22   : > { %276 = vperm.xlu1 %1120, %v212_v26   ;;  %271 = vperm.xlu0 %1119, %v211_v28  }
  0x26   : > { %286 = vperm.xlu1 %1120, %v214_v29   ;;  %281 = vperm.xlu0 %1119, %v213_v30  }
  0x27   : > { %1083 = vmatmul.mubr.msk.bf16.gmra.mxu0 %vm339_vm2, %v1126_v25  ;;  %1101 = vmatmul.mubr.msk.bf16.gmra.mxu1 %vm339_vm2, %v1126_v25 }
  0x28   : > { %1086 = vmatprep.mubr.msk.bf16.mxu0 %vm339_vm2, %v1127_v27  ;;  %1104 = vmatprep.mubr.msk.bf16.mxu1 %vm339_vm2, %v1127_v27 }
  0x2a   : > { %296 = vperm.xlu1 %1120, %v216_v32   ;;  %291 = vperm.xlu0 %1119, %v215_v33  }
  0x2f   : > { %1087 = vmatmul.mubr.msk.bf16.gmra.mxu0 %vm339_vm2, %v1128_v31  ;;  %1105 = vmatmul.mubr.msk.bf16.gmra.mxu1 %vm339_vm2, %v1128_v31  ;;  %vm968_vm2 = vcmask 1048512  }
  0x89   : > { %v222_v35 = vpop.permute.xlu0 %221  ;;  %v232_v37 = vpop.permute.xlu1 %231 }
  0x8d   : > { %v227_v36 = vpop.permute.xlu0 %226  ;;  %v237_v44 = vpop.permute.xlu1 %236 }
  0x91   : > { %v242_v40 = vpop.permute.xlu0 %241  ;;  %v1278_v59 = vpop.permute.xlu1 %246 }
  0x95   : > { %v252_v53 = vpop.permute.xlu0 %251  ;;  %v257_v8 = vpop.permute.xlu1 %256 }
  0x99   : > { %v262_v3 = vpop.permute.xlu0 %261  ;;  %v1282_v19 = vpop.permute.xlu1 %266 }
  0x9d   : > { %v1280_v16 = vpop.permute.xlu0 %271  ;;  %v277_v33 = vpop.permute.xlu1 %276 }
  0xa1   : > { %v282_v26 = vpop.permute.xlu0 %281 }
  0xd7   : > { %v1076_v38 = vpop.f32.mrf.mxu0  ;;  %v1094_v39 = vpop.f32.mrf.mxu1 }
  0xd8   : > { %v414_v41 = vadd.f32 %v1076_v38, %v232_v37  ;;  %v613_v46 = vadd.f32 %v1094_v39, %v232_v37  ;;  %v292_v39 = vpop.permute.xlu0 %291 }
  0xd9   : > { %v405_v42 = vpop.f32.mrf.mxu0  ;;  %v604_v43 = vpop.f32.mrf.mxu1 }
  0xda   : > { %v470_v45 = vmax.f32 %v414_v41, 0.0  ;;  %v605_v47 = vadd.f32 %v604_v43, %v222_v35  ;;  %v669_v54 = vmax.f32 %v613_v46, 0.0  ;;  %v406_v55 = vadd.f32 %v405_v42, %v222_v35  ;;  %v287_v42 = vpop.permute.xlu1 %286 }
  0xdb   : > { %v1077_v48 = vpop.f32.mrf.mxu0  ;;  %v1095_v49 = vpop.f32.mrf.mxu1 }
  0xdc   : > { %v667_v50 = vmax.f32 %v605_v47, 0.0  ;;  %504 = vadd.xlane.f32.xlu0 %v470_v45  ;;  %v468_v0 = vmax.f32 %v406_v55, 0.0  ;;  %v417_v1 = vadd.f32 %v1077_v48, %v237_v44  ;;  %v616_v10 = vadd.f32 %v1095_v49, %v237_v44 }
  0xdd   : > { %v408_v51 = vpop.f32.mrf.mxu0  ;;  %v607_v52 = vpop.f32.mrf.mxu1 }
  0xde   : > { %v409_v56 = vadd.f32 %v408_v51, %v227_v36  ;;  %699 = vadd.xlane.f32.xlu1 %v667_v50  ;;  %v471_v9 = vmax.f32 %v417_v1, 0.0  ;;  %v670_v17 = vmax.f32 %v616_v10, 0.0  ;;  %v608_v18 = vadd.f32 %v607_v52, %v227_v36  ;;  %v297_v52 = vpop.permute.xlu1 %296 }
  0xdf   : > { %v1080_v57 = vpop.f32.mrf.mxu0  ;;  %v1098_v58 = vpop.f32.mrf.mxu1 }
  0xe0   : > { %v469_v60 = vmax.f32 %v409_v56, 0.0  ;;  %v430_v61 = vadd.f32 %v1080_v57, %v252_v53  ;;  %703 = vadd.xlane.f32.xlu0 %v669_v54  ;;  %v629_v5 = vadd.f32 %v1098_v58, %v252_v53  ;;  %v668_v24 = vmax.f32 %v608_v18, 0.0 }
  0xe1   : > { %v421_v62 = vpop.f32.mrf.mxu0  ;;  %v620_v63 = vpop.f32.mrf.mxu1 }
  0xe2   : > { %502 = vadd.xlane.f32.xlu1 %v469_v60  ;;  %v474_v4 = vmax.f32 %v430_v61, 0.0  ;;  %v673_v12 = vmax.f32 %v629_v5, 0.0  ;;  %v422_v13 = vadd.f32 %v421_v62, %v242_v40  ;;  %v621_v25 = vadd.f32 %v620_v63, %v242_v40 }
  0xe3   : > { %v1081_v2 = vpop.f32.mrf.mxu0  ;;  %v1099_v6 = vpop.f32.mrf.mxu1 }
  0xe4   : > { %500 = vadd.xlane.f32.xlu0 %v468_v0  ;;  %v472_v20 = vmax.f32 %v422_v13, 0.0  ;;  %v671_v31 = vmax.f32 %v621_v25, 0.0  ;;  %v433_v32 = vadd.f32 %v1081_v2, %v257_v8  ;;  %v632_v38 = vadd.f32 %v1099_v6, %v257_v8 }
  0xe5   : > { %v424_v7 = vpop.f32.mrf.mxu0  ;;  %v623_v14 = vpop.f32.mrf.mxu1 }
  0xe6   : > { %512 = vadd.xlane.f32.xlu1 %v474_v4  ;;  %v475_v37 = vmax.f32 %v433_v32, 0.0  ;;  %v674_v44 = vmax.f32 %v632_v38, 0.0  ;;  %v425_v45 = vadd.f32 %v424_v7, %v1278_v59  ;;  %v624_v51 = vadd.f32 %v623_v14, %v1278_v59 }
  0xe7   : > { %v1084_v11 = vpop.f32.mrf.mxu0  ;;  %v1102_v22 = vpop.f32.mrf.mxu1 }
  0xe8   : > { %506 = vadd.xlane.f32.xlu0 %v471_v9  ;;  %v446_v21 = vadd.f32 %v1084_v11, %v1280_v16  ;;  %v473_v50 = vmax.f32 %v425_v45, 0.0  ;;  %v672_v57 = vmax.f32 %v624_v51, 0.0  ;;  %v645_v59 = vadd.f32 %v1102_v22, %v1280_v16  ;;  %v494_v45 = vld [vmem:[#allocation2 + $0x50] sm:$0xff] }
  0xe9   : > { %v437_v15 = vpop.f32.mrf.mxu0  ;;  %v636_v29 = vpop.f32.mrf.mxu1 }
  0xea   : > { %711 = vadd.xlane.f32.xlu1 %v673_v12  ;;  %v478_v27 = vmax.f32 %v446_v21, 0.0  ;;  %v438_v28 = vadd.f32 %v437_v15, %v262_v3  ;;  %v637_v35 = vadd.f32 %v636_v29, %v262_v3  ;;  %v677_v6 = vmax.f32 %v645_v59, 0.0  ;;  %v490_v29 = vld [vmem:[#allocation2 + $0x30] sm:$0xff] }
  0xeb   : > { %v1085_v23 = vpop.f32.mrf.mxu0  ;;  %v1103_v46 = vpop.f32.mrf.mxu1 }
  0xec   : > { %705 = vadd.xlane.f32.xlu0 %v670_v17  ;;  %v476_v34 = vmax.f32 %v438_v28, 0.0  ;;  %v675_v40 = vmax.f32 %v637_v35, 0.0  ;;  %v449_v58 = vadd.f32 %v1085_v23, %v277_v33  ;;  %v648_v8 = vadd.f32 %v1103_v46, %v277_v33  ;;  %v487_v33 = vld [vmem:[#allocation2 + $0x18] sm:$0xff] }
  0xed   : > { %v440_v30 = vpop.f32.mrf.mxu0  ;;  %v639_v53 = vpop.f32.mrf.mxu1 }
  0xee   : > { %508 = vadd.xlane.f32.xlu1 %v472_v20  ;;  %v479_v63 = vmax.f32 %v449_v58, 0.0  ;;  %v441_v0 = vadd.f32 %v440_v30, %v1282_v19  ;;  %v640_v4 = vadd.f32 %v639_v53, %v1282_v19  ;;  %v678_v13 = vmax.f32 %v648_v8, 0.0  ;;  %v486_v19 = vld [vmem:[#allocation2 + $0x10] sm:$0xff]  ;;  %v492_v58 = vld [vmem:[#allocation2 + $0x40] sm:$0xff] }
  0xef   : > { %v1088_v36 = vpop.f32.mrf.mxu0  ;;  %v1106_v60 = vpop.f32.mrf.mxu1  ;;  %v498_v8 = vld [vmem:[#allocation2 + $0x70] sm:$0xff] }
  0xf0   : > { %701 = vadd.xlane.f32.xlu0 %v668_v24  ;;  %v462_v41 = vadd.f32 %v1088_v36, %v292_v39  ;;  %v477_v3 = vmax.f32 %v441_v0, 0.0  ;;  %v676_v9 = vmax.f32 %v640_v4, 0.0  ;;  %v661_v11 = vadd.f32 %v1106_v60, %v292_v39  ;;  %v485_v24 = vld [vmem:[#allocation2 + $0x8] sm:$0xff] }
  0xf1   : > { %v453_v43 = vpop.f32.mrf.mxu0  ;;  %v652_v1 = vpop.f32.mrf.mxu1 }
  0xf2   : > { %520 = vadd.xlane.f32.xlu1 %v478_v27  ;;  %v482_v47 = vmax.f32 %v462_v41, 0.0  ;;  %v454_v48 = vadd.f32 %v453_v43, %v282_v26  ;;  %v653_v7 = vadd.f32 %v652_v1, %v282_v26  ;;  %v681_v15 = vmax.f32 %v661_v11, 0.0  ;;  %v484_v26 = vld [vmem:[#allocation2] sm:$0xff] }
  0xf3   : > { %v1089_v49 = vpop.f32.mrf.mxu0  ;;  %v1107_v5 = vpop.f32.mrf.mxu1 }
  0xf4   : > { %707 = vadd.xlane.f32.xlu0 %v671_v31  ;;  %v480_v54 = vmax.f32 %v454_v48, 0.0  ;;  %v465_v55 = vadd.f32 %v1089_v49, %v297_v52  ;;  %v679_v12 = vmax.f32 %v653_v7, 0.0  ;;  %v664_v16 = vadd.f32 %v1107_v5, %v297_v52 }
  0xf5   : > { %v456_v56 = vpop.f32.mrf.mxu0  ;;  %v655_v10 = vpop.f32.mrf.mxu1 }
  0xf6   : > { %516 = vadd.xlane.f32.xlu1 %v476_v34  ;;  %v483_v61 = vmax.f32 %v465_v55, 0.0  ;;  %v457_v62 = vadd.f32 %v456_v56, %v287_v42  ;;  %v656_v14 = vadd.f32 %v655_v10, %v287_v42  ;;  %v682_v18 = vmax.f32 %v664_v16, 0.0 }
  0xf8   : > { %514 = vadd.xlane.f32.xlu0 %v475_v37  ;;  %v481_v2 = vmax.f32 %v457_v62, 0.0  ;;  %v680_v17 = vmax.f32 %v656_v14, 0.0 }
  0xfa   : > { %715 = vadd.xlane.f32.xlu1 %v675_v40  ;;  %v488_v40 = vld [vmem:[#allocation2 + $0x20] sm:$0xff] }
  0xfc   : > { %713 = vadd.xlane.f32.xlu0 %v674_v44 }
  0xfe   : > { %528 = vadd.xlane.f32.xlu1 %v482_v47 }
 0x100   : > { %510 = vadd.xlane.f32.xlu0 %v473_v50 }
 0x102   : > { %524 = vadd.xlane.f32.xlu1 %v480_v54 }
 0x104   : > { %709 = vadd.xlane.f32.xlu0 %v672_v57 }
 0x106   : > { %530 = vadd.xlane.f32.xlu1 %v483_v61  ;;  %v491_v61 = vld [vmem:[#allocation2 + $0x38] sm:$0xff] }
 0x108   : > { %522 = vadd.xlane.f32.xlu0 %v479_v63 }
 0x10a   : > { %526 = vadd.xlane.f32.xlu1 %v481_v2 }
 0x10c   : > { %518 = vadd.xlane.f32.xlu0 %v477_v3 }
 0x10e   : > { %719 = vadd.xlane.f32.xlu1 %v677_v6 }
 0x110   : > { %717 = vadd.xlane.f32.xlu0 %v676_v9 }
 0x112   : > { %723 = vadd.xlane.f32.xlu1 %v679_v12 }
 0x114   : > { %721 = vadd.xlane.f32.xlu0 %v678_v13  ;;  %v489_v13 = vld [vmem:[#allocation2 + $0x28] sm:$0xff] }
 0x116   : > { %727 = vadd.xlane.f32.xlu1 %v681_v15 }
 0x118   : > { %725 = vadd.xlane.f32.xlu0 %v680_v17 }
 0x11c   : > { %729 = vadd.xlane.f32.xlu0 %v682_v18  ;;  %v496_v18 = vld [vmem:[#allocation2 + $0x60] sm:$0xff] }
 0x165   : > { %v505_v20 = vpop.xlane.xlu0 %504 }
 0x166   : > { %v534_v21 = vadd.f32 %v505_v20, %v486_v19 }
 0x167   : > { %v700_v22 = vpop.xlane.xlu1 %699 }
 0x168   : > { %550 = vst.msk [vmem:[#allocation2 + $0x10] sm:$0xff] %vm168_vm3, %v534_v21 }
 0x169   : > { %v704_v23 = vpop.xlane.xlu0 %703 }
 0x16b   : > { %v503_v25 = vpop.xlane.xlu1 %502 }
 0x16c   : > { %v533_v27 = vadd.f32 %v503_v25, %v485_v24 }
 0x16d   : > { %v501_v28 = vpop.xlane.xlu0 %500 }
 0x16e   : > { %549 = vst.msk [vmem:[#allocation2 + $0x8] sm:$0xff] %vm168_vm3, %v533_v27  ;;  %v532_v30 = vadd.f32 %v501_v28, %v484_v26  ;;  %v499_v28 = vld [vmem:[#allocation2 + $0x78] sm:$0xff] }
 0x16f   : > { %v685_v31 = vld [vmem:[#allocation2 + $0x10] sm:$0xff]  ;;  %v513_v32 = vpop.xlane.xlu1 %512 }
 0x170   : > { %v733_v34 = vadd.f32 %v704_v23, %v685_v31  ;;  %548 = vst.msk [vmem:[#allocation2] sm:$0xff] %vm168_vm3, %v532_v30  ;;  %v538_v35 = vadd.f32 %v513_v32, %v490_v29  ;;  %v495_v30 = vld [vmem:[#allocation2 + $0x58] sm:$0xff] }
 0x171   : > { %v507_v36 = vpop.xlane.xlu0 %506 }
 0x172   : > { %749 = vst.msk [vmem:[#allocation2 + $0x10] sm:$0xff] %vm168_vm3, %v733_v34  ;;  %554 = vst.msk [vmem:[#allocation2 + $0x30] sm:$0xff] %vm168_vm3, %v538_v35  ;;  %v535_v37 = vadd.f32 %v507_v36, %v487_v33  ;;  %v497_v33 = vld [vmem:[#allocation2 + $0x68] sm:$0xff] }
 0x173   : > { %v712_v38 = vpop.xlane.xlu1 %711 }
 0x174   : > { %551 = vst.msk [vmem:[#allocation2 + $0x18] sm:$0xff] %vm168_vm3, %v535_v37  ;;  %v493_v37 = vld [vmem:[#allocation2 + $0x48] sm:$0xff] }
 0x175   : > { %v706_v39 = vpop.xlane.xlu0 %705  ;;  %v684_v47 = vld [vmem:[#allocation2 + $0x8] sm:$0xff] }
 0x177   : > { %v683_v41 = vld [vmem:[#allocation2] sm:$0xff]  ;;  %v509_v42 = vpop.xlane.xlu1 %508 }
 0x178   : > { %v731_v43 = vadd.f32 %v700_v22, %v683_v41  ;;  %v536_v44 = vadd.f32 %v509_v42, %v488_v40 }
 0x179   : > { %v689_v46 = vld [vmem:[#allocation2 + $0x30] sm:$0xff]  ;;  %v702_v48 = vpop.xlane.xlu0 %701 }
 0x17a   : > { %v765_v49 = vld [vmem:[#allocation2 + $0x10] sm:$0xff]  ;;  %747 = vst.msk [vmem:[#allocation2] sm:$0xff] %vm168_vm3, %v731_v43  ;;  %v737_v50 = vadd.f32 %v712_v38, %v689_v46  ;;  %552 = vst.msk [vmem:[#allocation2 + $0x20] sm:$0xff] %vm168_vm3, %v536_v44  ;;  %v732_v51 = vadd.f32 %v702_v48, %v684_v47 }
 0x17b   : > { %v781_v52 = vmul.f32 0.00390625, %v765_v49  ;;  %v686_v53 = vld [vmem:[#allocation2 + $0x18] sm:$0xff]  ;;  %v521_v54 = vpop.xlane.xlu1 %520 }
 0x17c   : > { %753 = vst.msk [vmem:[#allocation2 + $0x30] sm:$0xff] %vm168_vm3, %v737_v50  ;;  %v734_v55 = vadd.f32 %v706_v39, %v686_v53  ;;  %748 = vst.msk [vmem:[#allocation2 + $0x8] sm:$0xff] %vm168_vm3, %v732_v51  ;;  %v542_v56 = vadd.f32 %v521_v54, %v494_v45 }
 0x17d   : > { %818 = vperm.xlu1 %1120, %v781_v52   ;;  %v708_v57 = vpop.xlane.xlu0 %707 }
 0x17e   : > { %750 = vst.msk [vmem:[#allocation2 + $0x18] sm:$0xff] %vm168_vm3, %v734_v55  ;;  %558 = vst.msk [vmem:[#allocation2 + $0x50] sm:$0xff] %vm168_vm3, %v542_v56 }
 0x17f   : > { %v517_v60 = vpop.xlane.xlu1 %516 }
 0x180   : > { %v540_v62 = vadd.f32 %v517_v60, %v492_v58 }
 0x181   : > { %v687_v63 = vld [vmem:[#allocation2 + $0x20] sm:$0xff]  ;;  %v515_v0 = vpop.xlane.xlu0 %514 }
 0x182   : > { %v763_v1 = vld [vmem:[#allocation2] sm:$0xff]  ;;  %v735_v59 = vadd.f32 %v708_v57, %v687_v63  ;;  %556 = vst.msk [vmem:[#allocation2 + $0x40] sm:$0xff] %vm168_vm3, %v540_v62  ;;  %v539_v2 = vadd.f32 %v515_v0, %v491_v61 }
 0x183   : > { %v779_v3 = vmul.f32 0.00390625, %v763_v1  ;;  %v716_v4 = vpop.xlane.xlu1 %715  ;;  %v764_v5 = vld [vmem:[#allocation2 + $0x8] sm:$0xff]  ;;  %v769_v10 = vld [vmem:[#allocation2 + $0x30] sm:$0xff] }
 0x184   : > { %751 = vst.msk [vmem:[#allocation2 + $0x20] sm:$0xff] %vm168_vm3, %v735_v59  ;;  %555 = vst.msk [vmem:[#allocation2 + $0x38] sm:$0xff] %vm168_vm3, %v539_v2  ;;  %v780_v6 = vmul.f32 0.00390625, %v764_v5  ;;  %v785_v15 = vmul.f32 0.00390625, %v769_v10 }
 0x185   : > { %812 = vperm.xlu1 %1120, %v779_v3   ;;  %v714_v7 = vpop.xlane.xlu0 %713  ;;  %v766_v9 = vld [vmem:[#allocation2 + $0x18] sm:$0xff]  ;;  %v693_v44 = vld [vmem:[#allocation2 + $0x50] sm:$0xff] }
 0x186   : > { %815 = vperm.xlu0 %1119, %v780_v6   ;;  %v782_v11 = vmul.f32 0.00390625, %v766_v9 }
 0x187   : > { %v529_v12 = vpop.xlane.xlu1 %528 }
 0x188   : > { %v546_v14 = vadd.f32 %v529_v12, %v498_v8 }
 0x189   : > { %821 = vperm.xlu1 %1120, %v782_v11   ;;  %v691_v16 = vld [vmem:[#allocation2 + $0x40] sm:$0xff]  ;;  %v511_v17 = vpop.xlane.xlu0 %510 }
 0x18a   : > { %v739_v19 = vadd.f32 %v716_v4, %v691_v16  ;;  %562 = vst.msk [vmem:[#allocation2 + $0x70] sm:$0xff] %vm168_vm3, %v546_v14  ;;  %v537_v20 = vadd.f32 %v511_v17, %v489_v13  ;;  %830 = vperm.xlu0 %1119, %v785_v15  }
 0x18b   : > { %v690_v21 = vld [vmem:[#allocation2 + $0x38] sm:$0xff]  ;;  %v525_v22 = vpop.xlane.xlu1 %524  ;;  %v767_v23 = vld [vmem:[#allocation2 + $0x20] sm:$0xff] }
 0x18c   : > { %755 = vst.msk [vmem:[#allocation2 + $0x40] sm:$0xff] %vm168_vm3, %v739_v19  ;;  %v738_v24 = vadd.f32 %v714_v7, %v690_v21  ;;  %553 = vst.msk [vmem:[#allocation2 + $0x28] sm:$0xff] %vm168_vm3, %v537_v20  ;;  %v544_v25 = vadd.f32 %v525_v22, %v496_v18  ;;  %v783_v26 = vmul.f32 0.00390625, %v767_v23  ;;  %v859_v19 = vlaneseq }
 0x18d   : > { %v710_v27 = vpop.xlane.xlu0 %709 }
 0x18e   : > { %754 = vst.msk [vmem:[#allocation2 + $0x38] sm:$0xff] %vm168_vm3, %v738_v24  ;;  %560 = vst.msk [vmem:[#allocation2 + $0x60] sm:$0xff] %vm168_vm3, %v544_v25  ;;  %824 = vperm.xlu0 %1119, %v783_v26   ;;  %v1322_v21 = vand.u32 127, %v859_v19  ;;  %v1325_v25 = vshrl.u32 %v859_v19, 7 }
 0x18f   : > { %v531_v29 = vpop.xlane.xlu1 %530 }
 0x190   : > { %v547_v31 = vadd.f32 %v531_v29, %v499_v28  ;;  %v865_v24 = vadd.s32 4294967288, %v1322_v21 }
 0x191   : > { %v523_v32 = vpop.xlane.xlu0 %522  ;;  %v697_v57 = vld [vmem:[#allocation2 + $0x70] sm:$0xff] }
 0x192   : > { %563 = vst.msk [vmem:[#allocation2 + $0x78] sm:$0xff] %vm168_vm3, %v547_v31  ;;  %v543_v34 = vadd.f32 %v523_v32, %v495_v30  ;;  %v868_v26 = vsub.s32 %v865_v24, %v1325_v25  ;;  %v863_v30 = vsub.s32 %v1322_v21, %v1325_v25  ;;  %v879_v31 = vadd.s32 4294967272, %v1322_v21 }
 0x193   : > { %v688_v35 = vld [vmem:[#allocation2 + $0x28] sm:$0xff]  ;;  %v527_v36 = vpop.xlane.xlu1 %526  ;;  %v771_v2 = vld [vmem:[#allocation2 + $0x40] sm:$0xff]  ;;  %v886_v32 = vadd.s32 4294967264, %v1322_v21 }
 0x194   : > { %v736_v38 = vadd.f32 %v710_v27, %v688_v35  ;;  %559 = vst.msk [vmem:[#allocation2 + $0x58] sm:$0xff] %vm168_vm3, %v543_v34  ;;  %v545_v39 = vadd.f32 %v527_v36, %v497_v33  ;;  %v787_v6 = vmul.f32 0.00390625, %v771_v2  ;;  %v872_v27 = vadd.s32 4294967280, %v1322_v21 }
 0x195   : > { %v519_v40 = vpop.xlane.xlu0 %518  ;;  %v770_v41 = vld [vmem:[#allocation2 + $0x38] sm:$0xff]  ;;  %v695_v48 = vld [vmem:[#allocation2 + $0x60] sm:$0xff]  ;;  %v893_v34 = vadd.s32 4294967256, %v1322_v21 }
 0x196   : > { %752 = vst.msk [vmem:[#allocation2 + $0x28] sm:$0xff] %vm168_vm3, %v736_v38  ;;  %561 = vst.msk [vmem:[#allocation2 + $0x68] sm:$0xff] %vm168_vm3, %v545_v39  ;;  %v541_v42 = vadd.f32 %v519_v40, %v493_v37  ;;  %v786_v43 = vmul.f32 0.00390625, %v770_v41  ;;  %v875_v35 = vsub.s32 %v872_v27, %v1325_v25  ;;  %v882_v38 = vsub.s32 %v879_v31, %v1325_v25 }
 0x197   : > { %v720_v45 = vpop.xlane.xlu1 %719  ;;  %v889_v39 = vsub.s32 %v886_v32, %v1325_v25 }
 0x198   : > { %557 = vst.msk [vmem:[#allocation2 + $0x48] sm:$0xff] %vm168_vm3, %v541_v42  ;;  %v741_v46 = vadd.f32 %v720_v45, %v693_v44  ;;  %833 = vperm.xlu1 %1120, %v786_v43   ;;  %v896_v42 = vsub.s32 %v893_v34, %v1325_v25  ;;  %v900_v44 = vadd.s32 4294967248, %v1322_v21 }
 0x199   : > { %v718_v47 = vpop.xlane.xlu0 %717  ;;  %v698_v3 = vld [vmem:[#allocation2 + $0x78] sm:$0xff] }
 0x19a   : > { %757 = vst.msk [vmem:[#allocation2 + $0x50] sm:$0xff] %vm168_vm3, %v741_v46 }
 0x19b   : > { %v724_v49 = vpop.xlane.xlu1 %723  ;;  %v694_v51 = vld [vmem:[#allocation2 + $0x58] sm:$0xff] }
 0x19c   : > { %v743_v50 = vadd.f32 %v724_v49, %v695_v48 }
 0x19d   : > { %v722_v52 = vpop.xlane.xlu0 %721  ;;  %v768_v53 = vld [vmem:[#allocation2 + $0x28] sm:$0xff] }
 0x19e   : > { %759 = vst.msk [vmem:[#allocation2 + $0x60] sm:$0xff] %vm168_vm3, %v743_v50  ;;  %v742_v54 = vadd.f32 %v722_v52, %v694_v51  ;;  %v784_v55 = vmul.f32 0.00390625, %v768_v53  ;;  %v696_v62 = vld [vmem:[#allocation2 + $0x68] sm:$0xff]  ;;  %v914_v50 = vadd.s32 4294967232, %v1322_v21  ;;  %v907_v51 = vadd.s32 4294967240, %v1322_v21 }
 0x19f   : > { %v692_v56 = vld [vmem:[#allocation2 + $0x48] sm:$0xff]  ;;  %v728_v58 = vpop.xlane.xlu1 %727  ;;  %v903_v53 = vsub.s32 %v900_v44, %v1325_v25 }
 0x1a0   : > { %v740_v60 = vadd.f32 %v718_v47, %v692_v56  ;;  %758 = vst.msk [vmem:[#allocation2 + $0x58] sm:$0xff] %vm168_vm3, %v742_v54  ;;  %v745_v61 = vadd.f32 %v728_v58, %v697_v57  ;;  %827 = vperm.xlu1 %1120, %v784_v55   ;;  %v921_v55 = vadd.s32 4294967224, %v1322_v21  ;;  %v928_v57 = vadd.s32 4294967216, %v1322_v21 }
 0x1a1   : > { %v726_v63 = vpop.xlane.xlu0 %725  ;;  %v773_v0 = vld [vmem:[#allocation2 + $0x50] sm:$0xff]  ;;  %v917_v58 = vsub.s32 %v914_v50, %v1325_v25 }
 0x1a2   : > { %756 = vst.msk [vmem:[#allocation2 + $0x48] sm:$0xff] %vm168_vm3, %v740_v60  ;;  %761 = vst.msk [vmem:[#allocation2 + $0x70] sm:$0xff] %vm168_vm3, %v745_v61  ;;  %v744_v1 = vadd.f32 %v726_v63, %v696_v62  ;;  %v789_v59 = vmul.f32 0.00390625, %v773_v0  ;;  %v910_v61 = vsub.s32 %v907_v51, %v1325_v25  ;;  %v935_v63 = vadd.s32 4294967208, %v1322_v21 }
 0x1a3   : > { %v924_v2 = vsub.s32 %v921_v55, %v1325_v25 }
 0x1a4   : > { %760 = vst.msk [vmem:[#allocation2 + $0x68] sm:$0xff] %vm168_vm3, %v744_v1  ;;  %842 = vperm.xlu0 %1119, %v789_v59   ;;  %v942_v59 = vadd.s32 4294967200, %v1322_v21 }
 0x1a5   : > { %v730_v4 = vpop.xlane.xlu0 %729  ;;  %v775_v8 = vld [vmem:[#allocation2 + $0x60] sm:$0xff] }
 0x1a6   : > { %v746_v5 = vadd.f32 %v730_v4, %v698_v3  ;;  %v791_v11 = vmul.f32 0.00390625, %v775_v8  ;;  %v949_v3 = vadd.s32 4294967192, %v1322_v21  ;;  %v938_v8 = vsub.s32 %v935_v63, %v1325_v25 }
 0x1a7   : > { %v774_v7 = vld [vmem:[#allocation2 + $0x58] sm:$0xff] }
 0x1a8   : > { %762 = vst.msk [vmem:[#allocation2 + $0x78] sm:$0xff] %vm168_vm3, %v746_v5  ;;  %836 = vperm.xlu0 %1119, %v787_v6   ;;  %v790_v9 = vmul.f32 0.00390625, %v774_v7  ;;  %v931_v5 = vsub.s32 %v928_v57, %v1325_v25 }
 0x1a9   : > { %v772_v10 = vld [vmem:[#allocation2 + $0x48] sm:$0xff]  ;;  %v777_v12 = vld [vmem:[#allocation2 + $0x70] sm:$0xff] }
 0x1aa   : > { %845 = vperm.xlu1 %1120, %v790_v9   ;;  %v788_v13 = vmul.f32 0.00390625, %v772_v10  ;;  %v793_v15 = vmul.f32 0.00390625, %v777_v12  ;;  %v945_v10 = vsub.s32 %v942_v59, %v1325_v25  ;;  %v956_v12 = vadd.s32 4294967184, %v1322_v21 }
 0x1ab   : > { %v776_v14 = vld [vmem:[#allocation2 + $0x68] sm:$0xff] }
 0x1ac   : > { %848 = vperm.xlu0 %1119, %v791_v11   ;;  %v792_v16 = vmul.f32 0.00390625, %v776_v14  ;;  %v959_v24 = vsub.s32 %v956_v12, %v1325_v25 }
 0x1ae   : > { %839 = vperm.xlu1 %1120, %v788_v13  }
 0x1af   : > { %v778_v17 = vld [vmem:[#allocation2 + $0x78] sm:$0xff] }
 0x1b0   : > { %854 = vperm.xlu0 %1119, %v793_v15   ;;  %v794_v18 = vmul.f32 0.00390625, %v778_v17  ;;  %v952_v15 = vsub.s32 %v949_v3, %v1325_v25 }
 0x1b2   : > { %851 = vperm.xlu1 %1120, %v792_v16   ;;  %v963_v16 = vadd.s32 4294967176, %v1322_v21 }
 0x1b6   : > { %857 = vperm.xlu1 %1120, %v794_v18  }
 0x1f8   : > { %v819_v20 = vpop.permute.xlu1 %818 }
 0x1f9   : > { %v876_v43 = vrot.slane %v819_v20, %v875_v35 }
 0x200   : > { %v813_v22 = vpop.permute.xlu1 %812 }
 0x201   : > { %v816_v23 = vpop.permute.xlu0 %815  ;;  %v864_v37 = vrot.slane %v813_v22, %v863_v30  ;;  %v966_v30 = vsub.s32 %v963_v16, %v1325_v25 }
 0x202   : > { %v869_v33 = vrot.slane %v816_v23, %v868_v26 }
 0x204   : > { %v822_v28 = vpop.permute.xlu1 %821  ;;  %v871_v41 = vsel %vm870_vm4, %v869_v33, %v864_v37 }
 0x205   : > { %v831_v29 = vpop.permute.xlu0 %830  ;;  %v883_v46 = vrot.slane %v822_v28, %v882_v38  ;;  %v878_v47 = vsel %vm877_vm5, %v876_v43, %v871_v41 }
 0x206   : > { %v904_v0 = vrot.slane %v831_v29, %v903_v53 }
 0x207   : > { %v885_v54 = vsel %vm884_vm6, %v883_v46, %v878_v47 }
 0x209   : > { %v825_v40 = vpop.permute.xlu0 %824 }
 0x20a   : > { %v890_v48 = vrot.slane %v825_v40, %v889_v39 }
 0x20c   : > { %v892_v56 = vsel %vm891_vm7, %v890_v48, %v885_v54 }
 0x213   : > { %v834_v36 = vpop.permute.xlu1 %833 }
 0x214   : > { %v911_v7 = vrot.slane %v834_v36, %v910_v61 }
 0x21b   : > { %v828_v45 = vpop.permute.xlu1 %827 }
 0x21c   : > { %v897_v52 = vrot.slane %v828_v45, %v896_v42 }
 0x21e   : > { %v899_v62 = vsel %vm898_vm8, %v897_v52, %v892_v56 }
 0x21f   : > { %v843_v49 = vpop.permute.xlu0 %842  ;;  %v906_v4 = vsel %vm905_vm9, %v904_v0, %v899_v62 }
 0x220   : > { %v913_v13 = vsel %vm912_vm10, %v911_v7, %v906_v4  ;;  %v932_v17 = vrot.slane %v843_v49, %v931_v5 }
 0x223   : > { %v837_v60 = vpop.permute.xlu0 %836 }
 0x224   : > { %v918_v6 = vrot.slane %v837_v60, %v917_v58 }
 0x225   : > { %v846_v1 = vpop.permute.xlu1 %845 }
 0x226   : > { %v920_v18 = vsel %vm919_vm11, %v918_v6, %v913_v13  ;;  %v939_v19 = vrot.slane %v846_v1, %v938_v8 }
 0x227   : > { %v849_v9 = vpop.permute.xlu0 %848 }
 0x228   : > { %v946_v22 = vrot.slane %v849_v9, %v945_v10 }
 0x229   : > { %v840_v11 = vpop.permute.xlu1 %839 }
 0x22a   : > { %v925_v14 = vrot.slane %v840_v11, %v924_v2 }
 0x22b   : > { %v855_v27 = vpop.permute.xlu0 %854 }
 0x22c   : > { %v927_v20 = vsel %vm926_vm12, %v925_v14, %v920_v18  ;;  %v960_v32 = vrot.slane %v855_v27, %v959_v24 }
 0x22d   : > { %v934_v23 = vsel %vm933_vm13, %v932_v17, %v927_v20  ;;  %v852_v26 = vpop.permute.xlu1 %851 }
 0x22e   : > { %v941_v28 = vsel %vm940_vm14, %v939_v19, %v934_v23  ;;  %v953_v29 = vrot.slane %v852_v26, %v952_v15 }
 0x22f   : > { %v948_v31 = vsel %vm947_vm15, %v946_v22, %v941_v28 }
 0x230   : > { %v955_v21 = vsel %vm954_vm0, %v953_v29, %v948_v31 }
 0x231   : > { %v858_v33 = vpop.permute.xlu1 %857  ;;  %v962_v35 = vsel %vm961_vm1, %v960_v32, %v955_v21 }
 0x232   : > { %v967_v34 = vrot.slane %v858_v33, %v966_v30 }
 0x234   : > { %v969_v36 = vsel %vm968_vm2, %v967_v34, %v962_v35 }
 0x235   : > { %971 = vst [vmem:[%s166_s18] sm:$0x1] %v969_v36 }
 0x236 PF: > { %s13_s12 = sadd.s32 1, %s1135_s12  }
 0x237   : > { %p10_p4 = scmp.ge.s32.totalorder %s13_s12, 4  }
 0x239   :  { %12 = sbr.rel (!%p10_p4) target bundleno = 1 (0x1), region = 63 }

</bundles_post_ra>
